<compile_context>
chip_gen: v6e
topology: v6e:2x2x1
jax: 0.10.0
libtpu: 0.0.40
codegen_flags: <defaults>
</compile_context>

<pallas_src>
import jax
import jax.numpy as jnp
from jax.experimental import pallas as pl
from jax.experimental.pallas import tpu as pltpu


def _coslu_kernel(a_ref, b_ref, x_ref, o_ref):
    # a_ref, b_ref: (1, 1) f32 scalars in SMEM; x_ref/o_ref: (block_rows, width) VMEM tiles.
    x = x_ref[...].astype(jnp.float32)   # single upcast; no per-op pack/unpack on v5e
    a = a_ref[0, 0]                      # read once, hoisted out of the expression
    b = b_ref[0, 0]
    # sigmoid(x) == 0.5 * (tanh(0.5 * x) + 1)  -> one EUP op, no exp + divide.
    sig = 0.5 * (jnp.tanh(0.5 * x) + 1.0)
    y = sig * (x + a * jnp.cos(b * x))
    o_ref[...] = y.astype(o_ref.dtype)


def coslu(x, a, b):
    """CosLU forward. x: any shape (e.g. NCHW). a, b: scalar params."""
    orig_shape = x.shape
    dtype = x.dtype
    itemsize = jnp.dtype(dtype).itemsize

    flat = x.reshape(-1)
    n = flat.shape[0]

    # Lane-dense width: the largest multiple-of-128 divisor of n (<= 1024), so
    # the common case needs neither a pad nor a final slice (each is a full
    # HBM round trip outside the kernel).
    width = None
    start = min(1024, (n // 128) * 128)
    for cand in range(start, 127, -128):
        if n % cand == 0:
            width = cand
            break
    if width is None:
        # Rare ragged-tail fallback (n not a multiple of 128): minimal pad.
        # TODO(synk): replace with an in-kernel masked store on the final block.
        width = 128
        flat = jnp.pad(flat, (0, (-n) % width))
    n_pad = flat.shape[0]
    rows = n_pad // width
    x2d = flat.reshape(rows, width)

    # Dtype-aware sublane alignment: (8,128) f32, (16,128) bf16, (32,128) int8/fp8.
    sub = {4: 8, 2: 16, 1: 32}.get(itemsize, 8)

    # ~2 MiB blocks; double-buffered in+out = ~8 MiB VMEM (fits v5e's 16 MiB
    # scoped default and v7x's 32 MiB). 1-4 MiB tiles already sit at ~85% of
    # HBM roofline, so we deliberately do NOT scale toward VMEM capacity.
    tgt_rows = max(sub, ((2 << 20) // (width * itemsize)) // sub * sub)

    if rows < 2 * sub:
        # Tiny tensor: one block equal to the full array dims (valid BlockSpec).
        block_rows = rows
    elif rows <= tgt_rows:
        # Small/medium tensor: force >= 2 grid steps so both v7x TensorCores
        # get work instead of leaving one idle behind a grid=(1,) launch.
        block_rows = max(sub, ((rows // 2) // sub) * sub)
    else:
        block_rows = tgt_rows
    grid = (pl.cdiv(rows, block_rows),)

    a2d = jnp.asarray(a, jnp.float32).reshape(1, 1)
    b2d = jnp.asarray(b, jnp.float32).reshape(1, 1)

    out2d = pl.pallas_call(
        _coslu_kernel,
        out_shape=jax.ShapeDtypeStruct((rows, width), dtype),
        grid_spec=pltpu.PrefetchScalarGridSpec(
            num_scalar_prefetch=0,
            grid=grid,
            in_specs=[
                pl.BlockSpec(memory_space=pltpu.MemorySpace.SMEM),   # a scalar
                pl.BlockSpec(memory_space=pltpu.MemorySpace.SMEM),   # b scalar
                pl.BlockSpec((block_rows, width), lambda i: (i, 0)),
            ],
            out_specs=pl.BlockSpec((block_rows, width), lambda i: (i, 0)),
        ),
        compiler_params=pltpu.CompilerParams(
            dimension_semantics=("parallel",)),
        cost_estimate=pl.CostEstimate(
            flops=10 * n_pad,                       # ~7 VALU + scalar fixups / elem
            transcendentals=2 * n_pad,              # tanh + cos
            bytes_accessed=2 * n_pad * itemsize),   # read + write of the padded slab
    )(a2d, b2d, x2d)

    out = out2d.reshape(-1)
    if n_pad != n:
        out = out[:n]
    return out.reshape(orig_shape)


def coslu_ref(x, a, b):
    xf = x.astype(jnp.float32)
    return (jax.nn.sigmoid(xf) * (xf + a * jnp.cos(b * xf))).astype(x.dtype)


if __name__ == "__main__":
    key = jax.random.PRNGKey(0)
    # NCHW input, matching PyTorch conv-style conventions
    x = jax.random.normal(key, (2, 4, 16, 16), dtype=jnp.float32)

    # Deterministic parameter init, matching nn.init.constant_(_, 1.0)
    a = jnp.float32(1.0)
    b = jnp.float32(1.0)

    out = jax.block_until_ready(coslu(x, a, b))

    ref = coslu_ref(x, a, b)
    assert out.shape == x.shape and out.dtype == x.dtype
    assert jnp.allclose(out, ref, atol=1e-5, rtol=1e-5)

    print("KERNEL_OK")
</pallas_src>

<mosaic_0001>
module attributes {stable_mosaic.version = 11 : i64} {
  func.func @_coslu_kernel(%arg0: i32, %arg1: memref<1x1xf32, #tpu.memory_space<smem>>, %arg2: memref<1x1xf32, #tpu.memory_space<smem>>, %arg3: memref<2x1024xf32, #tpu.memory_space<vmem>>, %arg4: memref<2x1024xf32, #tpu.memory_space<vmem>>) attributes {dimension_semantics = [#tpu.dimension_semantics<parallel>], iteration_bounds = array<i64: 1>, scalar_prefetch = 0 : i64, scratch_operands = 0 : i64, tpu.core_type = #tpu.core_type<tc>, window_params = [{transform_indices = @transform_0, window_bounds = array<i64: 1, 1>}, {transform_indices = @transform_1, window_bounds = array<i64: 1, 1>}, {transform_indices = @transform_2, window_bounds = array<i64: 2, 1024>}, {transform_indices = @transform_3, window_bounds = array<i64: 2, 1024>}]} {
    %c0 = arith.constant 0 : index
    %c0_0 = arith.constant 0 : index
    %0 = vector.load %arg3[%c0, %c0_0] : memref<2x1024xf32, #tpu.memory_space<vmem>>, vector<2x1024xf32>
    %c0_1 = arith.constant 0 : index
    %c0_2 = arith.constant 0 : index
    %1 = memref.load %arg1[%c0_1, %c0_2] : memref<1x1xf32, #tpu.memory_space<smem>>
    %c0_3 = arith.constant 0 : index
    %c0_4 = arith.constant 0 : index
    %2 = memref.load %arg2[%c0_3, %c0_4] : memref<1x1xf32, #tpu.memory_space<smem>>
    %cst = arith.constant 5.000000e-01 : f32
    %3 = vector.broadcast %cst : f32 to vector<2x1024xf32>
    %4 = arith.mulf %3, %0 : vector<2x1024xf32>
    %5 = math.tanh %4 : vector<2x1024xf32>
    %cst_5 = arith.constant 1.000000e+00 : f32
    %6 = vector.broadcast %cst_5 : f32 to vector<2x1024xf32>
    %7 = arith.addf %5, %6 : vector<2x1024xf32>
    %cst_6 = arith.constant 5.000000e-01 : f32
    %8 = vector.broadcast %cst_6 : f32 to vector<2x1024xf32>
    %9 = arith.mulf %8, %7 : vector<2x1024xf32>
    %10 = vector.broadcast %2 : f32 to vector<2x1024xf32>
    %11 = arith.mulf %10, %0 : vector<2x1024xf32>
    %12 = math.cos %11 : vector<2x1024xf32>
    %13 = vector.broadcast %1 : f32 to vector<2x1024xf32>
    %14 = arith.mulf %13, %12 : vector<2x1024xf32>
    %15 = arith.addf %0, %14 : vector<2x1024xf32>
    %16 = arith.mulf %9, %15 : vector<2x1024xf32>
    %c0_7 = arith.constant 0 : index
    %c0_8 = arith.constant 0 : index
    %17 = vector.load %arg4[%c0_7, %c0_8] : memref<2x1024xf32, #tpu.memory_space<vmem>>, vector<2x1024xf32>
    tpu.vector_store %arg4[%c0_7, %c0_8], %16 {strides = array<i32>} : memref<2x1024xf32, #tpu.memory_space<vmem>>, vector<2x1024xf32>,
    return
  }
  func.func @transform_0(%arg0: i32) -> (i32, i32) {
    %c0_i32 = arith.constant 0 : i32
    %c0_i32_0 = arith.constant 0 : i32
    %c0_i32_1 = arith.constant 0 : i32
    return %c0_i32, %c0_i32_0 : i32, i32
  }
  func.func @transform_1(%arg0: i32) -> (i32, i32) {
    %c0_i32 = arith.constant 0 : i32
    %c0_i32_0 = arith.constant 0 : i32
    %c0_i32_1 = arith.constant 0 : i32
    return %c0_i32, %c0_i32_0 : i32, i32
  }
  func.func @transform_2(%arg0: i32) -> (i32, i32) {
    %c0_i32 = arith.constant 0 : i32
    %c0_i32_0 = arith.constant 0 : i32
    return %arg0, %c0_i32 : i32, i32
  }
  func.func @transform_3(%arg0: i32) -> (i32, i32) {
    %c0_i32 = arith.constant 0 : i32
    %c0_i32_0 = arith.constant 0 : i32
    return %arg0, %c0_i32 : i32, i32
  }
}

</mosaic_0001>

<bundles_post_ra>
// kernel: tpu_custom_call.1
= control target key start
LH: loop header
LB: loop body
LE: loop exit
PB: predicated region body
PF: predicated region fallthrough
CT: control target
= control target key end

     0   :  { %10 = vsyncpa [#allocation5], 0  ;;  %s479_s0 = inlined_call_operand.<no memory space> [shape: f32[1,1], index: 0, kind: input, shape index: {}]   ;;  %s480_s1 = inlined_call_operand.<no memory space> [shape: f32[1,1], index: 1, kind: input, shape index: {}]   ;;  %s481_s2 = inlined_call_operand.hbm [shape: f32[2,1024], index: 2, kind: input, shape index: {}]   ;;  %s482_s3 = inlined_call_operand.hbm [shape: f32[2,1024], index: 3, kind: output, shape index: {}]  }
   0x1   :  { %11 = vsyncpa [#allocation6], 0  ;;  %s354_s12 = smov [#allocation4]  }
   0x2   :  { %s22_s13 = sshll.u32 %s354_s12, 4  ;;  %s23_s13 = int_to_ptr.vmem [resolvable:$true] %s22_s13 }
   0x3   :  { %s318_s14 = scalar_lea.vmem %s23_s13, 256  ;;  %p323_p1 = scmp.lt.s32.totalorder %s23_s13, %s23_s13 }
   0x4   :  { %p319_p0 = scmp.ne.s32.totalorder %s23_s13, %s318_s14  ;;  %p324_p2 = scmp.lt.s32.totalorder %s318_s14, %s318_s14 }
   0x6   :  { %p325_p3 = por %p324_p2, %p323_p1 }
   0x8   :  { %p326_p4 = pnand %p325_p3, %p319_p0 }
   0xa   :  { %329 = shalt.err (!%p326_p4)
}
   0xb   :  { %25 = dma.hbm_to_vmem [thread:$0]  %s481_s2, 256, %s23_s13, [#allocation5]  }
   0xc   :  { %350 = dma.done.wait [#allocation5], 256  }
   0xd   :  { %351 = vsyncadd [#allocation5], 4294967040  ;;  %v41_v0 = vstv %s480_s1  ;;  %v388_v1 = vld [vmem:[#allocation4] sm:$0xff]  ;;  %v390_v2 = vld [vmem:[#allocation4 + $0x8] sm:$0xff]  ;;  %v355_v22 = vmov 683565275  }
   0xe   :  { %v393_v3 = vmul.f32 %v41_v0, %v388_v1  ;;  %v396_v4 = vmul.f32 %v41_v0, %v390_v2  ;;  %v356_v24 = vmov 2475754826   ;;  %v357_v26 = vmov 2131351028  }
   0xf   :  { %v358_v28 = vmov 2102212464   ;;  %v359_v30 = vmov 920167782   ;;  %v360_v39 = vmov 1326507024  }
  0x10   :  { %v47_v5 = vand.u32 2139095040, %v393_v3  ;;  %v150_v7 = vand.u32 2139095040, %v396_v4  ;;  %v44_v8 = vand.u32 2147483647, %v393_v3  ;;  %v147_v11 = vand.u32 2147483647, %v396_v4 }
  0x11   :  { %vm46_vm14 = vcmp.lt.s32.totalorder %v393_v3, 0 }
  0x12   :  { %v48_v6 = vshrl.u32 %v47_v5, 23  ;;  %v151_v10 = vshrl.u32 %v150_v7, 23  ;;  %v51_v14 = vand.u32 8388607, %v44_v8  ;;  %v154_v17 = vand.u32 8388607, %v147_v11 }
  0x13   :  { %vm437_vm15 = vcmp.le.f32.partialorder %v44_v8, 0.7853982 }
  0x14   :  { %v274_v9 = vadd.s32 4294967169, %v48_v6  ;;  %v278_v13 = vadd.s32 4294967169, %v151_v10  ;;  %v52_v20 = vor.u32 8388608, %v51_v14  ;;  %v155_v32 = vor.u32 8388608, %v154_v17 }
  0x16   :  { %v54_v12 = vadd.s32 1, %v274_v9  ;;  %v157_v15 = vadd.s32 1, %v278_v13  ;;  %v92_v43 = vshll.u32 %v52_v20, 8  ;;  %v195_v57 = vshll.u32 %v155_v32, 8 }
  0x18   :  { %vm55_vm0 = vcmp.gt.s32.totalorder %v54_v12, 0  ;;  %vm158_vm1 = vcmp.gt.s32.totalorder %v157_v15, 0 }
  0x19   :  { %v56_v16 = vsel %vm55_vm0, %v54_v12, 0  ;;  %v159_v36 = vsel %vm158_vm1, %v157_v15, 0  ;;  %vm149_vm0 = vcmp.lt.s32.totalorder %v396_v4, 0  ;;  %vm454_vm1 = vcmp.le.f32.partialorder %v147_v11, 0.7853982 }
  0x1a   :  { %v58_v18 = vand.u32 31, %v56_v16  ;;  %v57_v19 = vshrl.u32 %v56_v16, 5  ;;  %v161_v49 = vand.u32 31, %v159_v36  ;;  %v160_v7 = vshrl.u32 %v159_v36, 5 }
  0x1c   :  { %v59_v21 = vsub.s32 32, %v58_v18  ;;  %v61_v23 = vshll.u32 %v355_v22, %v58_v18  ;;  %v64_v25 = vshll.u32 %v356_v24, %v58_v18  ;;  %v67_v27 = vshll.u32 %v357_v26, %v58_v18 }
  0x1d   :  { %v70_v29 = vshll.u32 %v358_v28, %v58_v18  ;;  %v73_v31 = vshll.u32 %v359_v30, %v58_v18  ;;  %vm76_vm2 = vcmp.lt.s32.totalorder %v57_v19, 1  ;;  %vm79_vm3 = vcmp.lt.s32.totalorder %v57_v19, 4 }
  0x1e   :  { %v60_v33 = vshrl.u32 %v355_v22, %v59_v21  ;;  %v62_v34 = vshrl.u32 %v356_v24, %v59_v21  ;;  %v65_v35 = vshrl.u32 %v357_v26, %v59_v21  ;;  %v68_v37 = vshrl.u32 %v358_v28, %v59_v21 }
  0x1f   :  { %v71_v38 = vshrl.u32 %v359_v30, %v59_v21  ;;  %v74_v40 = vshrl.u32 %v360_v39, %v59_v21  ;;  %vm78_vm4 = vcmp.lt.s32.totalorder %v57_v19, 3  ;;  %vm77_vm5 = vcmp.lt.s32.totalorder %v57_v19, 2 }
  0x20   :  { %v63_v41 = vor.u32 %v62_v34, %v61_v23  ;;  %v66_v42 = vor.u32 %v65_v35, %v64_v25  ;;  %v69_v44 = vor.u32 %v68_v37, %v67_v27  ;;  %v162_v61 = vsub.s32 32, %v161_v49 }
  0x21   :  { %v72_v45 = vor.u32 %v71_v38, %v70_v29  ;;  %v75_v46 = vor.u32 %v74_v40, %v73_v31  ;;  %v164_v9 = vshll.u32 %v355_v22, %v161_v49  ;;  %v167_v12 = vshll.u32 %v356_v24, %v161_v49 }
  0x22   :  { %v80_v47 = vsel %vm76_vm2, %v60_v33, %v63_v41  ;;  %v84_v48 = vsel %vm76_vm2, %v63_v41, %v66_v42  ;;  %v81_v50 = vsel %vm79_vm3, %v69_v44, 2102212464  ;;  %v88_v52 = vsel %vm76_vm2, %v66_v42, %v69_v44 }
  0x23   :  { %v85_v51 = vsel %vm79_vm3, %v72_v45, 920167782  ;;  %v89_v53 = vsel %vm79_vm3, %v75_v46, 1326507024  ;;  %v82_v54 = vsel %vm78_vm4, %v66_v42, %v81_v50  ;;  %v165_v10 = vshrl.u32 %v356_v24, %v162_v61 }
  0x24   :  { %v86_v55 = vsel %vm78_vm4, %v69_v44, %v85_v51  ;;  %v90_v56 = vsel %vm78_vm4, %v72_v45, %v89_v53  ;;  %v83_v58 = vsel %vm77_vm5, %v80_v47, %v82_v54  ;;  %v168_v13 = vshrl.u32 %v357_v26, %v162_v61 }
  0x25   :  { %v87_v59 = vsel %vm77_vm5, %v84_v48, %v86_v55  ;;  %v91_v60 = vsel %vm77_vm5, %v88_v52, %v90_v56  ;;  %v99_v6 = vmul.u32 %v92_v43, %v83_v58  ;;  %v170_v14 = vshll.u32 %v357_v26, %v161_v49 }
  0x26   :  { %v407_v62 = vmul.u32.u64.low %v92_v43, %v91_v60  ;;  %v408_v63 = vmul.u32.u64.high %v92_v43, %v91_v60, %v407_v62  ;;  %v410_v0 = vmul.u32.u64.low %v92_v43, %v87_v59  ;;  %v411_v5 = vmul.u32.u64.high %v92_v43, %v87_v59, %v410_v0 }
  0x27   :  { %v171_v15 = vshrl.u32 %v358_v28, %v162_v61  ;;  %v163_v16 = vshrl.u32 %v355_v22, %v162_v61  ;;  %v173_v17 = vshll.u32 %v358_v28, %v161_v49  ;;  %v174_v18 = vshrl.u32 %v359_v30, %v162_v61 }
  0x28   :  { %v176_v19 = vshll.u32 %v359_v30, %v161_v49  ;;  %vm101_vm6 = vc.u32 %v408_v63, %v410_v0  ;;  %v102_v20 = vadd.s32 1, %v411_v5  ;;  %v166_v21 = vor.u32 %v165_v10, %v164_v9 }
  0x29   :  { %v169_v23 = vor.u32 %v168_v13, %v167_v12  ;;  %v172_v25 = vor.u32 %v171_v15, %v170_v14  ;;  %v175_v27 = vor.u32 %v174_v18, %v173_v17  ;;  %v177_v29 = vshrl.u32 %v360_v39, %v162_v61 }
  0x2a   :  { %vm179_vm7 = vcmp.lt.s32.totalorder %v160_v7, 1  ;;  %v103_v31 = vsel %vm101_vm6, %v102_v20, %v411_v5  ;;  %vm180_vm8 = vcmp.lt.s32.totalorder %v160_v7, 2  ;;  %vm181_vm9 = vcmp.lt.s32.totalorder %v160_v7, 3 }
  0x2b   :  { %vm182_vm10 = vcmp.lt.s32.totalorder %v160_v7, 4  ;;  %v104_v24 = vadd.s32 %v103_v31, %v99_v6  ;;  %v178_v22 = vor.u32 %v177_v29, %v176_v19  ;;  %v183_v26 = vsel %vm179_vm7, %v163_v16, %v166_v21 }
  0x2c   :  { %v184_v28 = vsel %vm182_vm10, %v172_v25, 2102212464  ;;  %v187_v32 = vsel %vm179_vm7, %v166_v21, %v169_v23  ;;  %v188_v33 = vsel %vm182_vm10, %v175_v27, 920167782  ;;  %v191_v34 = vsel %vm179_vm7, %v169_v23, %v172_v25 }
  0x2d   :  { %v185_v30 = vsel %vm181_vm9, %v169_v23, %v184_v28  ;;  %v105_v35 = vadd.s32 536870912, %v104_v24  ;;  %v189_v36 = vsel %vm181_vm9, %v172_v25, %v188_v33  ;;  %v192_v37 = vsel %vm182_vm10, %v178_v22, 1326507024 }
  0x2e   :  { %v186_v38 = vsel %vm180_vm8, %v183_v26, %v185_v30  ;;  %v190_v39 = vsel %vm180_vm8, %v187_v32, %v189_v36  ;;  %v193_v40 = vsel %vm181_vm9, %v175_v27, %v192_v37  ;;  %v100_v61 = vadd.s32 %v410_v0, %v408_v63 }
  0x2f   :  { %v106_v41 = vshrl.u32 %v105_v35, 30  ;;  %v194_v42 = vsel %vm180_vm8, %v191_v34, %v193_v40  ;;  %v419_v43 = vmul.u32.u64.low %v195_v57, %v190_v39  ;;  %v420_v44 = vmul.u32.u64.high %v195_v57, %v190_v39, %v419_v43 }
  0x30   :  { %v422_v45 = vmul.u32.u64.low %v195_v57, %v194_v42  ;;  %v423_v46 = vmul.u32.u64.high %v195_v57, %v194_v42, %v422_v45  ;;  %v202_v48 = vmul.u32 %v195_v57, %v186_v38  ;;  %v33_v63 = vmul.f32 0.5, %v388_v1 }
  0x31   :  { %v107_v47 = vshll.u32 %v106_v41, 30  ;;  %v205_v50 = vadd.s32 1, %v420_v44  ;;  %v130_v30 = vsub.s32 4, %v106_v41  ;;  %v34_v40 = vmul.f32 0.5, %v390_v2 }
  0x32   :  { %vm204_vm11 = vc.u32 %v423_v46, %v419_v43  ;;  %v203_v21 = vadd.s32 %v419_v43, %v423_v46  ;;  %298 = vtanh.f32 %v33_v63  ;;  %vm136_vm5 = vweird.f32 %v393_v3 }
  0x33   :  { %v108_v49 = vsub.s32 %v104_v24, %v107_v47  ;;  %v206_v52 = vsel %vm204_vm11, %v205_v50, %v420_v44  ;;  %v131_v36 = vsel %vm46_vm14, %v130_v30, %v106_v41  ;;  %vm239_vm9 = vweird.f32 %v396_v4 }
  0x34   :  { %v207_v53 = vadd.s32 %v206_v52, %v202_v48  ;;  %v133_v39 = vsel %vm437_vm15, 0, %v131_v36 }
  0x35   :  { %v110_v51 = vsub.s32 0, %v108_v49  ;;  %v137_v44 = vand.u32 3, %v133_v39 }
  0x36   :  { %v208_v55 = vadd.s32 536870912, %v207_v53 }
  0x37   :  { %v275_v54 = vmin.u32 %v110_v51, %v108_v49  ;;  %vm142_vm2 = vcmp.eq.s32.totalorder %v137_v44, 2  ;;  %vm139_vm3 = vcmp.eq.s32.totalorder %v137_v44, 0  ;;  %vm138_vm4 = vcmp.lt.s32.totalorder %v137_v44, 2 }
  0x38   :  { %v428_v58 = vshrl.u32 %v208_v55, 30  ;;  %v250_v55 = vstv %s479_s0  ;;  %s361_s0 = smov [#allocation7]  }
  0x39   :  { %v112_v56 = vclz %v275_v54  ;;  %s265_s19 = sshll.u32 %s361_s0, 4  ;;  %s266_s19 = int_to_ptr.vmem [resolvable:$true] %s265_s19 }
  0x3a   :  { %v210_v60 = vshll.u32 %v428_v58, 30  ;;  %v233_v45 = vsub.s32 4, %v428_v58  ;;  %s330_s20 = scalar_lea.vmem %s266_s19, 256  ;;  %p335_p6 = scmp.lt.s32.totalorder %s266_s19, %s266_s19 }
  0x3b   :  { %v276_v59 = vadd.s32 4294967294, %v112_v56  ;;  %p331_p5 = scmp.ne.s32.totalorder %s266_s19, %s330_s20  ;;  %p336_p7 = scmp.lt.s32.totalorder %s330_s20, %s330_s20 }
  0x3c   :  { %v211_v62 = vsub.s32 %v207_v53, %v210_v60  ;;  %v234_v50 = vsel %vm149_vm0, %v233_v45, %v428_v58 }
  0x3d   :  { %vm277_vm12 = vcmp.lt.s32.totalorder %v276_v59, 0  ;;  %v236_v56 = vsel %vm454_vm1, 0, %v234_v50  ;;  %p337_p8 = por %p336_p7, %p335_p6 }
  0x3e   :  { %v115_v57 = vsel %vm277_vm12, 0, %v276_v59  ;;  %v213_v9 = vsub.s32 0, %v211_v62 }
  0x3f   :  { %v116_v5 = vsub.s32 32, %v115_v57  ;;  %v117_v6 = vshll.u32 %v108_v49, %v115_v57  ;;  %v120_v7 = vsub.s32 4294967266, %v115_v57  ;;  %v299_v47 = vpop.eup %298  ;;  %p338_p9 = pnand %p337_p8, %p331_p5 }
  0x40   :  { %v279_v13 = vmin.u32 %v213_v9, %v211_v62  ;;  %v37_v52 = vadd.f32 1.0, %v299_v47 }
  0x41   :  { %v118_v10 = vshrl.u32 %v100_v61, %v116_v5  ;;  %v121_v12 = vadd.s32 127, %v120_v7 }
  0x42   :  { %v215_v16 = vclz %v279_v13  ;;  %v39_v61 = vmul.f32 0.5, %v37_v52 }
  0x43   :  { %v119_v14 = vor.u32 %v118_v10, %v117_v6  ;;  %v122_v15 = vshll.u32 %v121_v12, 23 }
  0x44   :  { %v280_v19 = vadd.s32 4294967294, %v215_v16 }
  0x45   :  { %v123_v17 = vor.u32 4788187, %v122_v15  ;;  %v126_v18 = vcvt.s32.f32 %v119_v14 }
  0x46   :  { %vm281_vm13 = vcmp.lt.s32.totalorder %v280_v19, 0 }
  0x47   :  { %v124_v20 = vand.u32 2147483647, %v123_v17  ;;  %v218_v23 = vsel %vm281_vm13, 0, %v280_v19 }
  0x48   :  { %v219_v25 = vsub.s32 32, %v218_v23  ;;  %v220_v27 = vshll.u32 %v211_v62, %v218_v23  ;;  %v223_v29 = vsub.s32 4294967266, %v218_v23  ;;  %v240_v62 = vand.u32 3, %v236_v56 }
  0x49   :  { %v127_v0 = vmul.f32 %v126_v18, %v124_v20 }
  0x4a   :  { %v221_v22 = vshrl.u32 %v203_v21, %v219_v25  ;;  %v224_v26 = vadd.s32 127, %v223_v29  ;;  %vm245_vm6 = vcmp.eq.s32.totalorder %v240_v62, 2  ;;  %vm242_vm7 = vcmp.eq.s32.totalorder %v240_v62, 0 }
  0x4b   :  { %v128_v24 = vxor.u32 2147483648, %v127_v0  ;;  %vm241_vm8 = vcmp.lt.s32.totalorder %v240_v62, 2 }
  0x4c   :  { %v222_v33 = vor.u32 %v221_v22, %v220_v27  ;;  %v225_v34 = vshll.u32 %v224_v26, 23 }
  0x4d   :  { %v129_v28 = vsel %vm46_vm14, %v128_v24, %v127_v0 }
  0x4e   :  { %v132_v32 = vsel %vm437_vm15, %v393_v3, %v129_v28  ;;  %v226_v8 = vor.u32 4788187, %v225_v34  ;;  %v229_v35 = vcvt.s32.f32 %v222_v33 }
  0x4f   :  { %300 = vcosq.f32 %v132_v32 }
  0x50   :  { %302 = vsinq.f32 %v132_v32  ;;  %v227_v37 = vand.u32 2147483647, %v226_v8 }
  0x51   :  { %304 = vtanh.f32 %v34_v40 }
  0x52   :  { %v230_v38 = vmul.f32 %v229_v35, %v227_v37 }
  0x54   :  { %v231_v43 = vxor.u32 2147483648, %v230_v38 }
  0x56   :  { %v232_v41 = vsel %vm149_vm0, %v231_v43, %v230_v38 }
  0x57   :  { %v235_v46 = vsel %vm454_vm1, %v396_v4, %v232_v41 }
  0x58   :  { %306 = vcosq.f32 %v235_v46 }
  0x59   :  { %308 = vsinq.f32 %v235_v46 }
  0x5c   :  { %v301_v48 = vpop.eup %300 }
  0x5d   :  { %v303_v11 = vpop.eup %302  ;;  %v143_v49 = vxor.u32 2147483648, %v301_v48 }
  0x5e   :  { %v140_v51 = vxor.u32 2147483648, %v303_v11  ;;  %v305_v5 = vpop.eup %304 }
  0x5f   :  { %v144_v53 = vsel %vm142_vm2, %v143_v49, %v303_v11  ;;  %v38_v12 = vadd.f32 1.0, %v305_v5 }
  0x60   :  { %v141_v54 = vsel %vm139_vm3, %v301_v48, %v140_v51 }
  0x61   :  { %v145_v59 = vsel %vm138_vm4, %v141_v54, %v144_v53  ;;  %v40_v17 = vmul.f32 0.5, %v38_v12 }
  0x62   :  { %v146_v60 = vsel %vm136_vm5, nan, %v145_v59 }
  0x63   :  { %v251_v57 = vmul.f32 %v250_v55, %v146_v60 }
  0x65   :  { %v253_v58 = vadd.f32 %v251_v57, %v388_v1  ;;  %v307_v6 = vpop.eup %306 }
  0x66   :  { %v309_v3 = vpop.eup %308  ;;  %v246_v9 = vxor.u32 2147483648, %v307_v6 }
  0x67   :  { %v255_v7 = vmul.f32 %v253_v58, %v39_v61  ;;  %v243_v10 = vxor.u32 2147483648, %v309_v3 }
  0x68   :  { %v247_v13 = vsel %vm245_vm6, %v246_v9, %v309_v3 }
  0x69   :  { %257 = vst [vmem:[#allocation7] sm:$0xff] %v255_v7  ;;  %v244_v14 = vsel %vm242_vm7, %v307_v6, %v243_v10 }
  0x6a   :  { %v248_v15 = vsel %vm241_vm8, %v244_v14, %v247_v13 }
  0x6b   :  { %v249_v16 = vsel %vm239_vm9, nan, %v248_v15 }
  0x6c   :  { %v252_v18 = vmul.f32 %v250_v55, %v249_v16 }
  0x6e   :  { %v254_v1 = vadd.f32 %v252_v18, %v390_v2 }
  0x70   :  { %v256_v19 = vmul.f32 %v254_v1, %v40_v17 }
  0x72   :  { %258 = vst [vmem:[#allocation7 + $0x8] sm:$0xff] %v256_v19 }
  0x73   :  { %341 = shalt.err (!%p338_p9)
}
  0x74   :  { %268 = dma.vmem_to_hbm [thread:$0]  %s266_s19, 256, %s482_s3, [#allocation6]  }
  0x75   :  { %352 = dma.done.wait [#allocation6], 256  }
  0x76   :  { %353 = vsyncadd [#allocation6], 4294967040 }
  0x77   :  { %272 = vsyncpa [#allocation5], 1 }
  0x78   :  { %273 = vsyncpa [#allocation6], 1 }

</bundles_post_ra>
